<compile_context>
chip_gen: v6e
topology: v6e:2x2x1
jax: 0.10.0
libtpu: 0.0.40
codegen_flags: <defaults>
</compile_context>

<pallas_src>
import functools

import jax
import jax.numpy as jnp
from jax.experimental import pallas as pl
from jax.experimental.pallas import tpu as pltpu


# Flat per-batch scalar table layout (SMEM, shape (B*20,)); batch b starts at 20*b:
#   0..5  : A = K[:2,:] @ R   (row-major: A00 A01 A02 A10 A11 A12)
#   6..7  : b2 = K[:2,:] @ t
#   8..10 : R[2, :]
#   11    : t[2]
#   12..17: roi_extent_q0 per q0 channel (= roi_extent[[1,2,0,2,0,1]])
#   18    : imW - 1
#   19    : imH - 1
_NPARAM = 20
_COL_A0 = 0
_COL_A1 = 3
_COL_B2 = 6
_COL_R2 = 8
_COL_T2 = 11
_COL_EXT = 12
_COL_IMW = 18
_COL_IMH = 19

# per axis: (q0 channels used, positions of those channels in the 3-vector)
#   x-axis vec = (0,    d[0], d[1])
#   y-axis vec = (d[2], 0,    d[3])
#   z-axis vec = (d[4], d[5], 0   )
_AXIS_CH = ((0, 1), (2, 3), (4, 5))
_AXIS_J = ((1, 2), (0, 2), (0, 1))

_SR = 8  # strip rows (one f32 vreg of sublanes)


def _q_def_loss_kernel(r_rows, n_tiles, params_ref, q0_ref, occ_ref, u_ref,
                       out_ref):
    """Grid = (batch, pixel_tile).

    params_ref: (B*20,)              SMEM  per-batch scalar table (see above)
    q0_ref    : (1, 6, tile_r, 128)  VMEM  pred_Q0 slab (f32)
    occ_ref   : (1, 3, tile_r, 128)  VMEM  gt_occmask slab (f32, nonzero==visible)
    u_ref     : (1, 2, tile_r, 128)  VMEM  roi_2d slab (f32, unscaled in [0,1])
    out_ref   : (1, 6, 8, 128)       VMEM  resident accumulator:
                                           rows 0..2 -> per-axis |diff| partial sums
                                           rows 3..5 -> per-axis pixel counts
    """
    tile_r = q0_ref.shape[2]
    n_full = tile_r // _SR
    rem = tile_r % _SR
    # Only the last tile can run past r_rows; when the tiling is exact the
    # row tail-mask below compiles away entirely.
    needs_row_mask = (n_tiles * tile_r != r_rows)

    bi = pl.program_id(0)
    ti = pl.program_id(1)

    @pl.when(ti == 0)
    def _():
        out_ref[...] = jnp.zeros_like(out_ref)

    base = bi * _NPARAM

    def prm(i):
        return params_ref[base + i]

    a_r0 = tuple(prm(_COL_A0 + i) for i in range(3))   # (K[:2]@R) row 0
    a_r1 = tuple(prm(_COL_A1 + i) for i in range(3))   # (K[:2]@R) row 1
    b20 = prm(_COL_B2)
    b21 = prm(_COL_B2 + 1)
    r2 = tuple(prm(_COL_R2 + i) for i in range(3))     # R[2, :]
    t2 = prm(_COL_T2)
    ext = tuple(prm(_COL_EXT + i) for i in range(6))
    im_w = prm(_COL_IMW)                                # imW - 1
    im_h = prm(_COL_IMH)                                # imH - 1

    row0_tile = ti * tile_r

    def strip(start, size, carry):
        """Accumulate one (size, 128) pixel strip into the register carry."""
        rs = pl.ds(start, size)
        u0 = u_ref[0, 0, rs, :] * im_w
        u1 = u_ref[0, 1, rs, :] * im_h
        if needs_row_mask:
            rows = (row0_tile + start
                    + jax.lax.broadcasted_iota(jnp.int32, (size, 128), 0))
            row_ok = rows < r_rows
        sums, cnts = carry
        new_s, new_c = [], []
        for a in range(3):
            c0, c1 = _AXIS_CH[a]
            j0, j1 = _AXIS_J[a]
            # denormalize: (pred_Q0 - 0.5) * roi_extent_q0[c]
            v0 = (q0_ref[0, c0, rs, :] - 0.5) * ext[c0]
            v1 = (q0_ref[0, c1, rs, :] - 0.5) * ext[c1]
            # z = (R @ q0 + t)[2]   (one q0 component is identically zero)
            z = r2[j0] * v0 + r2[j1] * v1 + t2
            # (K @ (R q0 + t))[0:2] with K folded into R:  p = A q0 + b2
            p0 = a_r0[j0] * v0 + a_r0[j1] * v1 + b20
            p1 = a_r1[j0] * v0 + a_r1[j1] * v1 + b21
            m = (jnp.abs(z) > 1e-4) & (occ_ref[0, a, rs, :] != 0.0)
            if needs_row_mask:
                m = m & row_ok
            zs = jnp.where(m, z, 1.0)
            # EUP reciprocal + one Newton step: VALU slot stays free, ~f32 accuracy.
            inv = pl.reciprocal(zs, approx=True)
            inv = inv * (2.0 - zs * inv)
            contrib = jnp.where(
                m, jnp.abs(p0 * inv - u0) + jnp.abs(p1 * inv - u1), 0.0)
            new_s.append(sums[a] + contrib)
            new_c.append(cnts[a] + m.astype(jnp.float32))
        return tuple(new_s), tuple(new_c)

    if n_full > 0:
        z8 = jnp.zeros((_SR, 128), jnp.float32)
        init = ((z8, z8, z8), (z8, z8, z8))

        def body(s, carry):
            return strip(pl.multiple_of(s * _SR, _SR), _SR, carry)

        unroll = True if n_full <= 8 else 8
        sums, cnts = jax.lax.fori_loop(0, n_full, body, init, unroll=unroll)
        for a in range(3):
            out_ref[0, a] += sums[a]
            out_ref[0, 3 + a] += cnts[a]

    if rem > 0:
        zr = jnp.zeros((rem, 128), jnp.float32)
        sums, cnts = strip(n_full * _SR, rem, ((zr, zr, zr), (zr, zr, zr)))
        for a in range(3):
            out_ref[0, a, :rem, :] += sums[a]
            out_ref[0, 3 + a, :rem, :] += cnts[a]


def _q_def_loss_impl(rots, pred_Q0, gt_occmask, roi_extent, transes, roi_2d,
                     imH, imW, K, *, max_tile_r=512):
    """JAX/Pallas equivalent of Q_def_loss.forward (loss_type='L1', weight=1.0)."""
    b, c6, h, w = pred_Q0.shape
    assert c6 == 6
    # TODO(synk): quaternion rots (last dim == 4, quat2mat_torch) not supported.
    if K.size <= 9:                       # matches `if K.numel() > 9` else-branch
        return jnp.zeros((), jnp.float32)

    f32 = jnp.float32
    n = h * w
    n_pad = pl.cdiv(n, 128) * 128
    r_rows = n_pad // 128

    # Reshapes below are layout-preserving (no HBM pass).  The jnp.pad only fires
    # when h*w % 128 != 0; casts only fire for non-f32 inputs.
    # TODO(synk): ship pred_Q0 / roi_2d as bf16 on v5e/v6e to halve HBM bytes.
    def to_slab(x):
        c = x.shape[1]
        if x.dtype != f32:
            x = x.astype(f32)
        xf = x.reshape(b, c, n)
        if n_pad != n:
            xf = jnp.pad(xf, ((0, 0), (0, 0), (0, n_pad - n)))  # occ pad=0 -> masked
        return xf.reshape(b, c, r_rows, 128)

    q0_s = to_slab(pred_Q0)
    occ_s = to_slab(gt_occmask)    # nonzero == visible
    u_s = to_slab(roi_2d)

    # Pixel tile: as large as possible (multiple of 8 rows) within a modest VMEM
    # budget; ragged last tile handled by the in-kernel row mask.
    if r_rows <= max_tile_r:
        tile_r = r_rows                               # full extent (always legal)
    else:
        tile_r = max(_SR, (max_tile_r // _SR) * _SR)
    n_tiles = pl.cdiv(r_rows, tile_r)

    # Per-batch scalar table: fold K into R / t once, outside the hot loop.
    rots32 = rots.astype(f32)
    k32 = K.astype(f32)
    t32 = transes.astype(f32)
    k2 = k32[:, :2, :]                                           # (B,2,3)
    a_fold = jnp.einsum('bij,bjk->bik', k2, rots32).reshape(b, 6)
    b2 = jnp.einsum('bij,bj->bi', k2, t32)                       # (B,2)
    ext_q0 = roi_extent.astype(f32)[:, jnp.array([1, 2, 0, 2, 0, 1])]
    params = jnp.concatenate(
        [a_fold, b2, rots32[:, 2, :], t32[:, 2:3], ext_q0,
         (imW.astype(f32) - 1.0)[:, None], (imH.astype(f32) - 1.0)[:, None]],
        axis=1).reshape(-1)                                      # (B*20,) flat

    kernel = functools.partial(_q_def_loss_kernel, r_rows, n_tiles)

    out = pl.pallas_call(
        kernel,
        out_shape=jax.ShapeDtypeStruct((b, 6, _SR, 128), jnp.float32),
        grid_spec=pltpu.PrefetchScalarGridSpec(
            num_scalar_prefetch=0,
            grid=(b, n_tiles),
            in_specs=[
                pl.BlockSpec(memory_space=pltpu.SMEM),            # params (B*20,)
                pl.BlockSpec((1, 6, tile_r, 128), lambda bi, ti: (bi, 0, ti, 0)),
                pl.BlockSpec((1, 3, tile_r, 128), lambda bi, ti: (bi, 0, ti, 0)),
                pl.BlockSpec((1, 2, tile_r, 128), lambda bi, ti: (bi, 0, ti, 0)),
            ],
            out_specs=pl.BlockSpec((1, 6, _SR, 128),
                                   lambda bi, ti: (bi, 0, 0, 0)),
        ),
        compiler_params=pltpu.CompilerParams(
            dimension_semantics=("parallel", "arbitrary"),
            vmem_limit_bytes=32 * 1024 * 1024),
    )(params, q0_s, occ_s, u_s)

    # Lane/sublane-dense partials -> final (tiny) cross-lane reduction in XLA.
    sums = jnp.sum(out[:, 0:3], axis=(0, 2, 3))      # (3,) per-axis masked L1 sums
    counts = jnp.sum(out[:, 3:6], axis=(0, 2, 3))    # (3,) per-axis masked counts

    # `if z_mask.sum() < b*3: loss=0 else mean(|q0_n - u|)` (mean over M rows x 2 cols)
    loss_axes = jnp.where(counts < float(b * 3),
                          jnp.zeros_like(sums),
                          sums / (2.0 * jnp.maximum(counts, 1.0)))
    return jnp.sum(loss_axes) / 572.5


q_def_loss = jax.jit(_q_def_loss_impl, static_argnames=("max_tile_r",))


def _reference_loss(rots, pred_Q0, gt_occmask, roi_extent, transes, roi_2d,
                    imH, imW, K):
    """Pure-JAX transcription of the PyTorch forward, for verification."""
    b, _, h, w = pred_Q0.shape
    n = h * w
    bim = jnp.stack([imW - 1.0, imH - 1.0], axis=1)           # (b,2)
    roi2d = roi_2d * bim[:, :, None, None]
    ext_q0 = jnp.stack([roi_extent[:, 1], roi_extent[:, 2], roi_extent[:, 0],
                        roi_extent[:, 2], roi_extent[:, 0], roi_extent[:, 1]],
                       axis=1)                                # (b,6)
    dQ0 = (pred_Q0 - 0.5) * ext_q0[:, :, None, None]
    zeros = jnp.zeros((b, h, w), jnp.float32)
    q0s = [jnp.stack([zeros, dQ0[:, 0], dQ0[:, 1]], axis=1).reshape(b, 3, n),
           jnp.stack([dQ0[:, 2], zeros, dQ0[:, 3]], axis=1).reshape(b, 3, n),
           jnp.stack([dQ0[:, 4], dQ0[:, 5], zeros], axis=1).reshape(b, 3, n)]
    u = roi2d.reshape(b, 2, n).transpose(0, 2, 1)             # (b,n,2)
    total = jnp.zeros((), jnp.float32)
    for a, q0 in enumerate(q0s):
        Q = jnp.einsum('bij,bjn->bin', rots, q0) + transes[:, :, None]
        P = jnp.einsum('bij,bjn->bin', K, Q).transpose(0, 2, 1)   # (b,n,3)
        occ = gt_occmask[:, a].reshape(b, n) != 0
        mask = (jnp.abs(Q[:, 2, :]) > 1e-4) & occ
        cnt = jnp.sum(mask.astype(jnp.float32))
        z_safe = jnp.where(mask, Q[:, 2, :], 1.0)
        diff = (jnp.abs(P[:, :, 0] / z_safe - u[:, :, 0])
                + jnp.abs(P[:, :, 1] / z_safe - u[:, :, 1]))
        s = jnp.sum(jnp.where(mask, diff, 0.0))
        loss_a = jnp.where(cnt < float(b * 3), 0.0,
                           s / (2.0 * jnp.maximum(cnt, 1.0)))
        total = total + loss_a
    return total / 572.5


def _make_inputs(key, b, h, w):
    ks = jax.random.split(key, 7)
    raw = jax.random.normal(ks[0], (b, 3, 3), jnp.float32)
    rots, _ = jnp.linalg.qr(raw)                              # proper-ish rotations
    pred_Q0 = jax.random.uniform(ks[1], (b, 6, h, w), jnp.float32)
    gt_occmask = (jax.random.uniform(ks[2], (b, 3, h, w)) > 0.3).astype(jnp.float32)
    roi_extent = jax.random.uniform(ks[3], (b, 3), jnp.float32,
                                    minval=0.05, maxval=0.3)
    transes = jnp.concatenate(
        [jax.random.uniform(ks[4], (b, 2), jnp.float32, minval=-0.05, maxval=0.05),
         jax.random.uniform(ks[5], (b, 1), jnp.float32, minval=0.5, maxval=1.0)],
        axis=1)
    roi_2d = jax.random.uniform(ks[6], (b, 2, h, w), jnp.float32)
    imH = jnp.full((b,), 480.0, jnp.float32)
    imW = jnp.full((b,), 640.0, jnp.float32)
    K = jnp.tile(jnp.array([[572.4114, 0.0, 325.2611],
                            [0.0, 573.5704, 242.0490],
                            [0.0, 0.0, 1.0]], jnp.float32)[None], (b, 1, 1))
    return (rots, pred_Q0, gt_occmask, roi_extent, transes, roi_2d, imH, imW, K)


if __name__ == "__main__":
    key = jax.random.PRNGKey(0)
    # (h, w, max_tile_r):
    #   16x16       -> tail-strip-only path, single tile
    #   64x52       -> fori_loop strips + tail strip, single tile
    #   40x40, T=8  -> wrapper pad (h*w % 128 != 0) + multi-tile + row tail-mask
    cases = [(16, 16, 512), (64, 52, 512), (40, 40, 8)]
    for i, (h, w, mtr) in enumerate(cases):
        args = _make_inputs(jax.random.fold_in(key, i), 2, h, w)
        loss = jax.block_until_ready(q_def_loss(*args, max_tile_r=mtr))
        ref = jax.block_until_ready(_reference_loss(*args))
        if not bool(jnp.allclose(loss, ref, rtol=1e-4, atol=1e-5)):
            raise AssertionError(
                f"mismatch (h={h} w={w} tile={mtr}): pallas={loss} ref={ref}")
    print("KERNEL_OK")
</pallas_src>

<mosaic_0001>
module attributes {stable_mosaic.version = 11 : i64} {
  func.func @_q_def_loss_kernel(%arg0: i32, %arg1: i32, %arg2: memref<40xf32, #tpu.memory_space<smem>>, %arg3: memref<1x6x2x128xf32, #tpu.memory_space<vmem>>, %arg4: memref<1x3x2x128xf32, #tpu.memory_space<vmem>>, %arg5: memref<1x2x2x128xf32, #tpu.memory_space<vmem>>, %arg6: memref<1x6x8x128xf32, #tpu.memory_space<vmem>>) attributes {dimension_semantics = [#tpu.dimension_semantics<parallel>, #tpu.dimension_semantics<arbitrary>], iteration_bounds = array<i64: 2, 1>, scalar_prefetch = 0 : i64, scratch_operands = 0 : i64, tpu.core_type = #tpu.core_type<tc>, window_params = [{transform_indices = @transform_0, window_bounds = array<i64: 40>}, {transform_indices = @transform_1, window_bounds = array<i64: 1, 6, 2, 128>}, {transform_indices = @transform_2, window_bounds = array<i64: 1, 3, 2, 128>}, {transform_indices = @transform_3, window_bounds = array<i64: 1, 2, 2, 128>}, {transform_indices = @transform_4, window_bounds = array<i64: 1, 6, 8, 128>}]} {
    %c0_i32 = arith.constant 0 : i32
    %0 = arith.cmpi eq, %arg1, %c0_i32 : i32
    %1 = arith.extui %0 : i1 to i32
    %c0_i32_0 = arith.constant 0 : i32
    %2 = arith.cmpi ne, %1, %c0_i32_0 : i32
    scf.if %2 {
      %cst_109 = arith.constant 0.000000e+00 : f32
      %292 = vector.broadcast %cst_109 : f32 to vector<1x6x8x128xf32>
      %c0_110 = arith.constant 0 : index
      %c0_111 = arith.constant 0 : index
      %c0_112 = arith.constant 0 : index
      %c0_113 = arith.constant 0 : index
      %293 = vector.load %arg6[%c0_110, %c0_111, %c0_112, %c0_113] : memref<1x6x8x128xf32, #tpu.memory_space<vmem>>, vector<1x6x8x128xf32>
      tpu.vector_store %arg6[%c0_110, %c0_111, %c0_112, %c0_113], %292 {strides = array<i32>} : memref<1x6x8x128xf32, #tpu.memory_space<vmem>>, vector<1x6x8x128xf32>,
    } else {
    }
    %c20_i32 = arith.constant 20 : i32
    %3 = arith.muli %arg0, %c20_i32 : i32
    %c0_i32_1 = arith.constant 0 : i32
    %4 = arith.addi %3, %c0_i32_1 : i32
    %5 = arith.index_cast %4 : i32 to index
    %6 = memref.load %arg2[%5] : memref<40xf32, #tpu.memory_space<smem>>
    %c1_i32 = arith.constant 1 : i32
    %7 = arith.addi %3, %c1_i32 : i32
    %8 = arith.index_cast %7 : i32 to index
    %9 = memref.load %arg2[%8] : memref<40xf32, #tpu.memory_space<smem>>
    %c2_i32 = arith.constant 2 : i32
    %10 = arith.addi %3, %c2_i32 : i32
    %11 = arith.index_cast %10 : i32 to index
    %12 = memref.load %arg2[%11] : memref<40xf32, #tpu.memory_space<smem>>
    %c3_i32 = arith.constant 3 : i32
    %13 = arith.addi %3, %c3_i32 : i32
    %14 = arith.index_cast %13 : i32 to index
    %15 = memref.load %arg2[%14] : memref<40xf32, #tpu.memory_space<smem>>
    %c4_i32 = arith.constant 4 : i32
    %16 = arith.addi %3, %c4_i32 : i32
    %17 = arith.index_cast %16 : i32 to index
    %18 = memref.load %arg2[%17] : memref<40xf32, #tpu.memory_space<smem>>
    %c5_i32 = arith.constant 5 : i32
    %19 = arith.addi %3, %c5_i32 : i32
    %20 = arith.index_cast %19 : i32 to index
    %21 = memref.load %arg2[%20] : memref<40xf32, #tpu.memory_space<smem>>
    %c6_i32 = arith.constant 6 : i32
    %22 = arith.addi %3, %c6_i32 : i32
    %23 = arith.index_cast %22 : i32 to index
    %24 = memref.load %arg2[%23] : memref<40xf32, #tpu.memory_space<smem>>
    %c7_i32 = arith.constant 7 : i32
    %25 = arith.addi %3, %c7_i32 : i32
    %26 = arith.index_cast %25 : i32 to index
    %27 = memref.load %arg2[%26] : memref<40xf32, #tpu.memory_space<smem>>
    %c8_i32 = arith.constant 8 : i32
    %28 = arith.addi %3, %c8_i32 : i32
    %29 = arith.index_cast %28 : i32 to index
    %30 = memref.load %arg2[%29] : memref<40xf32, #tpu.memory_space<smem>>
    %c9_i32 = arith.constant 9 : i32
    %31 = arith.addi %3, %c9_i32 : i32
    %32 = arith.index_cast %31 : i32 to index
    %33 = memref.load %arg2[%32] : memref<40xf32, #tpu.memory_space<smem>>
    %c10_i32 = arith.constant 10 : i32
    %34 = arith.addi %3, %c10_i32 : i32
    %35 = arith.index_cast %34 : i32 to index
    %36 = memref.load %arg2[%35] : memref<40xf32, #tpu.memory_space<smem>>
    %c11_i32 = arith.constant 11 : i32
    %37 = arith.addi %3, %c11_i32 : i32
    %38 = arith.index_cast %37 : i32 to index
    %39 = memref.load %arg2[%38] : memref<40xf32, #tpu.memory_space<smem>>
    %c12_i32 = arith.constant 12 : i32
    %40 = arith.addi %3, %c12_i32 : i32
    %41 = arith.index_cast %40 : i32 to index
    %42 = memref.load %arg2[%41] : memref<40xf32, #tpu.memory_space<smem>>
    %c13_i32 = arith.constant 13 : i32
    %43 = arith.addi %3, %c13_i32 : i32
    %44 = arith.index_cast %43 : i32 to index
    %45 = memref.load %arg2[%44] : memref<40xf32, #tpu.memory_space<smem>>
    %c14_i32 = arith.constant 14 : i32
    %46 = arith.addi %3, %c14_i32 : i32
    %47 = arith.index_cast %46 : i32 to index
    %48 = memref.load %arg2[%47] : memref<40xf32, #tpu.memory_space<smem>>
    %c15_i32 = arith.constant 15 : i32
    %49 = arith.addi %3, %c15_i32 : i32
    %50 = arith.index_cast %49 : i32 to index
    %51 = memref.load %arg2[%50] : memref<40xf32, #tpu.memory_space<smem>>
    %c16_i32 = arith.constant 16 : i32
    %52 = arith.addi %3, %c16_i32 : i32
    %53 = arith.index_cast %52 : i32 to index
    %54 = memref.load %arg2[%53] : memref<40xf32, #tpu.memory_space<smem>>
    %c17_i32 = arith.constant 17 : i32
    %55 = arith.addi %3, %c17_i32 : i32
    %56 = arith.index_cast %55 : i32 to index
    %57 = memref.load %arg2[%56] : memref<40xf32, #tpu.memory_space<smem>>
    %c18_i32 = arith.constant 18 : i32
    %58 = arith.addi %3, %c18_i32 : i32
    %59 = arith.index_cast %58 : i32 to index
    %60 = memref.load %arg2[%59] : memref<40xf32, #tpu.memory_space<smem>>
    %c19_i32 = arith.constant 19 : i32
    %61 = arith.addi %3, %c19_i32 : i32
    %62 = arith.index_cast %61 : i32 to index
    %63 = memref.load %arg2[%62] : memref<40xf32, #tpu.memory_space<smem>>
    %cst = arith.constant 0.000000e+00 : f32
    %64 = vector.broadcast %cst : f32 to vector<2x128xf32>
    %c0 = arith.constant 0 : index
    %c0_2 = arith.constant 0 : index
    %c0_3 = arith.constant 0 : index
    %c0_4 = arith.constant 0 : index
    %65 = vector.load %arg5[%c0, %c0_2, %c0_3, %c0_4] : memref<1x2x2x128xf32, #tpu.memory_space<vmem>>, vector<1x1x2x128xf32>
    %66 = vector.shape_cast %65 : vector<1x1x2x128xf32> to vector<2x128xf32>
    %67 = vector.broadcast %60 : f32 to vector<2x128xf32>
    %68 = arith.mulf %66, %67 : vector<2x128xf32>
    %c0_5 = arith.constant 0 : index
    %c1 = arith.constant 1 : index
    %c0_6 = arith.constant 0 : index
    %c0_7 = arith.constant 0 : index
    %69 = vector.load %arg5[%c0_5, %c1, %c0_6, %c0_7] : memref<1x2x2x128xf32, #tpu.memory_space<vmem>>, vector<1x1x2x128xf32>
    %70 = vector.shape_cast %69 : vector<1x1x2x128xf32> to vector<2x128xf32>
    %71 = vector.broadcast %63 : f32 to vector<2x128xf32>
    %72 = arith.mulf %70, %71 : vector<2x128xf32>
    %c0_8 = arith.constant 0 : index
    %c0_9 = arith.constant 0 : index
    %c0_10 = arith.constant 0 : index
    %c0_11 = arith.constant 0 : index
    %73 = vector.load %arg3[%c0_8, %c0_9, %c0_10, %c0_11] : memref<1x6x2x128xf32, #tpu.memory_space<vmem>>, vector<1x1x2x128xf32>
    %74 = vector.shape_cast %73 : vector<1x1x2x128xf32> to vector<2x128xf32>
    %cst_12 = arith.constant 5.000000e-01 : f32
    %75 = vector.broadcast %cst_12 : f32 to vector<2x128xf32>
    %76 = arith.subf %74, %75 : vector<2x128xf32>
    %77 = vector.broadcast %42 : f32 to vector<2x128xf32>
    %78 = arith.mulf %76, %77 : vector<2x128xf32>
    %c0_13 = arith.constant 0 : index
    %c1_14 = arith.constant 1 : index
    %c0_15 = arith.constant 0 : index
    %c0_16 = arith.constant 0 : index
    %79 = vector.load %arg3[%c0_13, %c1_14, %c0_15, %c0_16] : memref<1x6x2x128xf32, #tpu.memory_space<vmem>>, vector<1x1x2x128xf32>
    %80 = vector.shape_cast %79 : vector<1x1x2x128xf32> to vector<2x128xf32>
    %cst_17 = arith.constant 5.000000e-01 : f32
    %81 = vector.broadcast %cst_17 : f32 to vector<2x128xf32>
    %82 = arith.subf %80, %81 : vector<2x128xf32>
    %83 = vector.broadcast %45 : f32 to vector<2x128xf32>
    %84 = arith.mulf %82, %83 : vector<2x128xf32>
    %85 = vector.broadcast %33 : f32 to vector<2x128xf32>
    %86 = arith.mulf %85, %78 : vector<2x128xf32>
    %87 = vector.broadcast %36 : f32 to vector<2x128xf32>
    %88 = arith.mulf %87, %84 : vector<2x128xf32>
    %89 = arith.addf %86, %88 : vector<2x128xf32>
    %90 = vector.broadcast %39 : f32 to vector<2x128xf32>
    %91 = arith.addf %89, %90 : vector<2x128xf32>
    %92 = vector.broadcast %9 : f32 to vector<2x128xf32>
    %93 = arith.mulf %92, %78 : vector<2x128xf32>
    %94 = vector.broadcast %12 : f32 to vector<2x128xf32>
    %95 = arith.mulf %94, %84 : vector<2x128xf32>
    %96 = arith.addf %93, %95 : vector<2x128xf32>
    %97 = vector.broadcast %24 : f32 to vector<2x128xf32>
    %98 = arith.addf %96, %97 : vector<2x128xf32>
    %99 = vector.broadcast %18 : f32 to vector<2x128xf32>
    %100 = arith.mulf %99, %78 : vector<2x128xf32>
    %101 = vector.broadcast %21 : f32 to vector<2x128xf32>
    %102 = arith.mulf %101, %84 : vector<2x128xf32>
    %103 = arith.addf %100, %102 : vector<2x128xf32>
    %104 = vector.broadcast %27 : f32 to vector<2x128xf32>
    %105 = arith.addf %103, %104 : vector<2x128xf32>
    %106 = math.absf %91 : vector<2x128xf32>
    %cst_18 = arith.constant 9.99999974E-5 : f32
    %107 = vector.broadcast %cst_18 : f32 to vector<2x128xf32>
    %108 = arith.cmpf ogt, %106, %107 : vector<2x128xf32>
    %c0_19 = arith.constant 0 : index
    %c0_20 = arith.constant 0 : index
    %c0_21 = arith.constant 0 : index
    %c0_22 = arith.constant 0 : index
    %109 = vector.load %arg4[%c0_19, %c0_20, %c0_21, %c0_22] : memref<1x3x2x128xf32, #tpu.memory_space<vmem>>, vector<1x1x2x128xf32>
    %110 = vector.shape_cast %109 : vector<1x1x2x128xf32> to vector<2x128xf32>
    %cst_23 = arith.constant 0.000000e+00 : f32
    %111 = vector.broadcast %cst_23 : f32 to vector<2x128xf32>
    %112 = arith.cmpf one, %110, %111 : vector<2x128xf32>
    %113 = arith.andi %108, %112 : vector<2x128xi1>
    %cst_24 = arith.constant 1.000000e+00 : f32
    %114 = vector.broadcast %cst_24 : f32 to vector<2x128xf32>
    %115 = arith.select %113, %91, %114 : vector<2x128xi1>, vector<2x128xf32>
    %116 = tpu.reciprocal %115 {approx = true} : vector<2x128xf32> -> vector<2x128xf32>
    %117 = arith.mulf %115, %116 : vector<2x128xf32>
    %cst_25 = arith.constant 2.000000e+00 : f32
    %118 = vector.broadcast %cst_25 : f32 to vector<2x128xf32>
    %119 = arith.subf %118, %117 : vector<2x128xf32>
    %120 = arith.mulf %116, %119 : vector<2x128xf32>
    %121 = arith.mulf %98, %120 : vector<2x128xf32>
    %122 = arith.subf %121, %68 : vector<2x128xf32>
    %123 = math.absf %122 : vector<2x128xf32>
    %124 = arith.mulf %105, %120 : vector<2x128xf32>
    %125 = arith.subf %124, %72 : vector<2x128xf32>
    %126 = math.absf %125 : vector<2x128xf32>
    %127 = arith.addf %123, %126 : vector<2x128xf32>
    %cst_26 = arith.constant 0.000000e+00 : f32
    %128 = vector.broadcast %cst_26 : f32 to vector<2x128xf32>
    %129 = arith.select %113, %127, %128 : vector<2x128xi1>, vector<2x128xf32>
    %130 = arith.addf %64, %129 : vector<2x128xf32>
    %131 = arith.extui %113 : vector<2x128xi1> to vector<2x128xi32>
    %132 = arith.sitofp %131 : vector<2x128xi32> to vector<2x128xf32>
    %133 = arith.addf %64, %132 : vector<2x128xf32>
    %c0_27 = arith.constant 0 : index
    %c2 = arith.constant 2 : index
    %c0_28 = arith.constant 0 : index
    %c0_29 = arith.constant 0 : index
    %134 = vector.load %arg3[%c0_27, %c2, %c0_28, %c0_29] : memref<1x6x2x128xf32, #tpu.memory_space<vmem>>, vector<1x1x2x128xf32>
    %135 = vector.shape_cast %134 : vector<1x1x2x128xf32> to vector<2x128xf32>
    %cst_30 = arith.constant 5.000000e-01 : f32
    %136 = vector.broadcast %cst_30 : f32 to vector<2x128xf32>
    %137 = arith.subf %135, %136 : vector<2x128xf32>
    %138 = vector.broadcast %48 : f32 to vector<2x128xf32>
    %139 = arith.mulf %137, %138 : vector<2x128xf32>
    %c0_31 = arith.constant 0 : index
    %c3 = arith.constant 3 : index
    %c0_32 = arith.constant 0 : index
    %c0_33 = arith.constant 0 : index
    %140 = vector.load %arg3[%c0_31, %c3, %c0_32, %c0_33] : memref<1x6x2x128xf32, #tpu.memory_space<vmem>>, vector<1x1x2x128xf32>
    %141 = vector.shape_cast %140 : vector<1x1x2x128xf32> to vector<2x128xf32>
    %cst_34 = arith.constant 5.000000e-01 : f32
    %142 = vector.broadcast %cst_34 : f32 to vector<2x128xf32>
    %143 = arith.subf %141, %142 : vector<2x128xf32>
    %144 = vector.broadcast %51 : f32 to vector<2x128xf32>
    %145 = arith.mulf %143, %144 : vector<2x128xf32>
    %146 = vector.broadcast %30 : f32 to vector<2x128xf32>
    %147 = arith.mulf %146, %139 : vector<2x128xf32>
    %148 = vector.broadcast %36 : f32 to vector<2x128xf32>
    %149 = arith.mulf %148, %145 : vector<2x128xf32>
    %150 = arith.addf %147, %149 : vector<2x128xf32>
    %151 = vector.broadcast %39 : f32 to vector<2x128xf32>
    %152 = arith.addf %150, %151 : vector<2x128xf32>
    %153 = vector.broadcast %6 : f32 to vector<2x128xf32>
    %154 = arith.mulf %153, %139 : vector<2x128xf32>
    %155 = vector.broadcast %12 : f32 to vector<2x128xf32>
    %156 = arith.mulf %155, %145 : vector<2x128xf32>
    %157 = arith.addf %154, %156 : vector<2x128xf32>
    %158 = vector.broadcast %24 : f32 to vector<2x128xf32>
    %159 = arith.addf %157, %158 : vector<2x128xf32>
    %160 = vector.broadcast %15 : f32 to vector<2x128xf32>
    %161 = arith.mulf %160, %139 : vector<2x128xf32>
    %162 = vector.broadcast %21 : f32 to vector<2x128xf32>
    %163 = arith.mulf %162, %145 : vector<2x128xf32>
    %164 = arith.addf %161, %163 : vector<2x128xf32>
    %165 = vector.broadcast %27 : f32 to vector<2x128xf32>
    %166 = arith.addf %164, %165 : vector<2x128xf32>
    %167 = math.absf %152 : vector<2x128xf32>
    %cst_35 = arith.constant 9.99999974E-5 : f32
    %168 = vector.broadcast %cst_35 : f32 to vector<2x128xf32>
    %169 = arith.cmpf ogt, %167, %168 : vector<2x128xf32>
    %c0_36 = arith.constant 0 : index
    %c1_37 = arith.constant 1 : index
    %c0_38 = arith.constant 0 : index
    %c0_39 = arith.constant 0 : index
    %170 = vector.load %arg4[%c0_36, %c1_37, %c0_38, %c0_39] : memref<1x3x2x128xf32, #tpu.memory_space<vmem>>, vector<1x1x2x128xf32>
    %171 = vector.shape_cast %170 : vector<1x1x2x128xf32> to vector<2x128xf32>
    %cst_40 = arith.constant 0.000000e+00 : f32
    %172 = vector.broadcast %cst_40 : f32 to vector<2x128xf32>
    %173 = arith.cmpf one, %171, %172 : vector<2x128xf32>
    %174 = arith.andi %169, %173 : vector<2x128xi1>
    %cst_41 = arith.constant 1.000000e+00 : f32
    %175 = vector.broadcast %cst_41 : f32 to vector<2x128xf32>
    %176 = arith.select %174, %152, %175 : vector<2x128xi1>, vector<2x128xf32>
    %177 = tpu.reciprocal %176 {approx = true} : vector<2x128xf32> -> vector<2x128xf32>
    %178 = arith.mulf %176, %177 : vector<2x128xf32>
    %cst_42 = arith.constant 2.000000e+00 : f32
    %179 = vector.broadcast %cst_42 : f32 to vector<2x128xf32>
    %180 = arith.subf %179, %178 : vector<2x128xf32>
    %181 = arith.mulf %177, %180 : vector<2x128xf32>
    %182 = arith.mulf %159, %181 : vector<2x128xf32>
    %183 = arith.subf %182, %68 : vector<2x128xf32>
    %184 = math.absf %183 : vector<2x128xf32>
    %185 = arith.mulf %166, %181 : vector<2x128xf32>
    %186 = arith.subf %185, %72 : vector<2x128xf32>
    %187 = math.absf %186 : vector<2x128xf32>
    %188 = arith.addf %184, %187 : vector<2x128xf32>
    %cst_43 = arith.constant 0.000000e+00 : f32
    %189 = vector.broadcast %cst_43 : f32 to vector<2x128xf32>
    %190 = arith.select %174, %188, %189 : vector<2x128xi1>, vector<2x128xf32>
    %191 = arith.addf %64, %190 : vector<2x128xf32>
    %192 = arith.extui %174 : vector<2x128xi1> to vector<2x128xi32>
    %193 = arith.sitofp %192 : vector<2x128xi32> to vector<2x128xf32>
    %194 = arith.addf %64, %193 : vector<2x128xf32>
    %c0_44 = arith.constant 0 : index
    %c4 = arith.constant 4 : index
    %c0_45 = arith.constant 0 : index
    %c0_46 = arith.constant 0 : index
    %195 = vector.load %arg3[%c0_44, %c4, %c0_45, %c0_46] : memref<1x6x2x128xf32, #tpu.memory_space<vmem>>, vector<1x1x2x128xf32>
    %196 = vector.shape_cast %195 : vector<1x1x2x128xf32> to vector<2x128xf32>
    %cst_47 = arith.constant 5.000000e-01 : f32
    %197 = vector.broadcast %cst_47 : f32 to vector<2x128xf32>
    %198 = arith.subf %196, %197 : vector<2x128xf32>
    %199 = vector.broadcast %54 : f32 to vector<2x128xf32>
    %200 = arith.mulf %198, %199 : vector<2x128xf32>
    %c0_48 = arith.constant 0 : index
    %c5 = arith.constant 5 : index
    %c0_49 = arith.constant 0 : index
    %c0_50 = arith.constant 0 : index
    %201 = vector.load %arg3[%c0_48, %c5, %c0_49, %c0_50] : memref<1x6x2x128xf32, #tpu.memory_space<vmem>>, vector<1x1x2x128xf32>
    %202 = vector.shape_cast %201 : vector<1x1x2x128xf32> to vector<2x128xf32>
    %cst_51 = arith.constant 5.000000e-01 : f32
    %203 = vector.broadcast %cst_51 : f32 to vector<2x128xf32>
    %204 = arith.subf %202, %203 : vector<2x128xf32>
    %205 = vector.broadcast %57 : f32 to vector<2x128xf32>
    %206 = arith.mulf %204, %205 : vector<2x128xf32>
    %207 = vector.broadcast %30 : f32 to vector<2x128xf32>
    %208 = arith.mulf %207, %200 : vector<2x128xf32>
    %209 = vector.broadcast %33 : f32 to vector<2x128xf32>
    %210 = arith.mulf %209, %206 : vector<2x128xf32>
    %211 = arith.addf %208, %210 : vector<2x128xf32>
    %212 = vector.broadcast %39 : f32 to vector<2x128xf32>
    %213 = arith.addf %211, %212 : vector<2x128xf32>
    %214 = vector.broadcast %6 : f32 to vector<2x128xf32>
    %215 = arith.mulf %214, %200 : vector<2x128xf32>
    %216 = vector.broadcast %9 : f32 to vector<2x128xf32>
    %217 = arith.mulf %216, %206 : vector<2x128xf32>
    %218 = arith.addf %215, %217 : vector<2x128xf32>
    %219 = vector.broadcast %24 : f32 to vector<2x128xf32>
    %220 = arith.addf %218, %219 : vector<2x128xf32>
    %221 = vector.broadcast %15 : f32 to vector<2x128xf32>
    %222 = arith.mulf %221, %200 : vector<2x128xf32>
    %223 = vector.broadcast %18 : f32 to vector<2x128xf32>
    %224 = arith.mulf %223, %206 : vector<2x128xf32>
    %225 = arith.addf %222, %224 : vector<2x128xf32>
    %226 = vector.broadcast %27 : f32 to vector<2x128xf32>
    %227 = arith.addf %225, %226 : vector<2x128xf32>
    %228 = math.absf %213 : vector<2x128xf32>
    %cst_52 = arith.constant 9.99999974E-5 : f32
    %229 = vector.broadcast %cst_52 : f32 to vector<2x128xf32>
    %230 = arith.cmpf ogt, %228, %229 : vector<2x128xf32>
    %c0_53 = arith.constant 0 : index
    %c2_54 = arith.constant 2 : index
    %c0_55 = arith.constant 0 : index
    %c0_56 = arith.constant 0 : index
    %231 = vector.load %arg4[%c0_53, %c2_54, %c0_55, %c0_56] : memref<1x3x2x128xf32, #tpu.memory_space<vmem>>, vector<1x1x2x128xf32>
    %232 = vector.shape_cast %231 : vector<1x1x2x128xf32> to vector<2x128xf32>
    %cst_57 = arith.constant 0.000000e+00 : f32
    %233 = vector.broadcast %cst_57 : f32 to vector<2x128xf32>
    %234 = arith.cmpf one, %232, %233 : vector<2x128xf32>
    %235 = arith.andi %230, %234 : vector<2x128xi1>
    %cst_58 = arith.constant 1.000000e+00 : f32
    %236 = vector.broadcast %cst_58 : f32 to vector<2x128xf32>
    %237 = arith.select %235, %213, %236 : vector<2x128xi1>, vector<2x128xf32>
    %238 = tpu.reciprocal %237 {approx = true} : vector<2x128xf32> -> vector<2x128xf32>
    %239 = arith.mulf %237, %238 : vector<2x128xf32>
    %cst_59 = arith.constant 2.000000e+00 : f32
    %240 = vector.broadcast %cst_59 : f32 to vector<2x128xf32>
    %241 = arith.subf %240, %239 : vector<2x128xf32>
    %242 = arith.mulf %238, %241 : vector<2x128xf32>
    %243 = arith.mulf %220, %242 : vector<2x128xf32>
    %244 = arith.subf %243, %68 : vector<2x128xf32>
    %245 = math.absf %244 : vector<2x128xf32>
    %246 = arith.mulf %227, %242 : vector<2x128xf32>
    %247 = arith.subf %246, %72 : vector<2x128xf32>
    %248 = math.absf %247 : vector<2x128xf32>
    %249 = arith.addf %245, %248 : vector<2x128xf32>
    %cst_60 = arith.constant 0.000000e+00 : f32
    %250 = vector.broadcast %cst_60 : f32 to vector<2x128xf32>
    %251 = arith.select %235, %249, %250 : vector<2x128xi1>, vector<2x128xf32>
    %252 = arith.addf %64, %251 : vector<2x128xf32>
    %253 = arith.extui %235 : vector<2x128xi1> to vector<2x128xi32>
    %254 = arith.sitofp %253 : vector<2x128xi32> to vector<2x128xf32>
    %255 = arith.addf %64, %254 : vector<2x128xf32>
    %c0_61 = arith.constant 0 : index
    %c0_62 = arith.constant 0 : index
    %c0_63 = arith.constant 0 : index
    %c0_64 = arith.constant 0 : index
    %256 = vector.load %arg6[%c0_61, %c0_62, %c0_63, %c0_64] : memref<1x6x8x128xf32, #tpu.memory_space<vmem>>, vector<1x1x2x128xf32>
    %257 = vector.shape_cast %256 : vector<1x1x2x128xf32> to vector<2x128xf32>
    %258 = arith.addf %257, %130 : vector<2x128xf32>
    %c0_65 = arith.constant 0 : index
    %c0_66 = arith.constant 0 : index
    %c0_67 = arith.constant 0 : index
    %c0_68 = arith.constant 0 : index
    %259 = vector.load %arg6[%c0_65, %c0_66, %c0_67, %c0_68] : memref<1x6x8x128xf32, #tpu.memory_space<vmem>>, vector<1x1x2x128xf32>
    %260 = vector.shape_cast %259 : vector<1x1x2x128xf32> to vector<2x128xf32>
    %261 = vector.shape_cast %258 : vector<2x128xf32> to vector<1x1x2x128xf32>
    tpu.vector_store %arg6[%c0_65, %c0_66, %c0_67, %c0_68], %261 {strides = array<i32>} : memref<1x6x8x128xf32, #tpu.memory_space<vmem>>, vector<1x1x2x128xf32>,
    %c0_69 = arith.constant 0 : index
    %c3_70 = arith.constant 3 : index
    %c0_71 = arith.constant 0 : index
    %c0_72 = arith.constant 0 : index
    %262 = vector.load %arg6[%c0_69, %c3_70, %c0_71, %c0_72] : memref<1x6x8x128xf32, #tpu.memory_space<vmem>>, vector<1x1x2x128xf32>
    %263 = vector.shape_cast %262 : vector<1x1x2x128xf32> to vector<2x128xf32>
    %264 = arith.addf %263, %133 : vector<2x128xf32>
    %c0_73 = arith.constant 0 : index
    %c3_74 = arith.constant 3 : index
    %c0_75 = arith.constant 0 : index
    %c0_76 = arith.constant 0 : index
    %265 = vector.load %arg6[%c0_73, %c3_74, %c0_75, %c0_76] : memref<1x6x8x128xf32, #tpu.memory_space<vmem>>, vector<1x1x2x128xf32>
    %266 = vector.shape_cast %265 : vector<1x1x2x128xf32> to vector<2x128xf32>
    %267 = vector.shape_cast %264 : vector<2x128xf32> to vector<1x1x2x128xf32>
    tpu.vector_store %arg6[%c0_73, %c3_74, %c0_75, %c0_76], %267 {strides = array<i32>} : memref<1x6x8x128xf32, #tpu.memory_space<vmem>>, vector<1x1x2x128xf32>,
    %c0_77 = arith.constant 0 : index
    %c1_78 = arith.constant 1 : index
    %c0_79 = arith.constant 0 : index
    %c0_80 = arith.constant 0 : index
    %268 = vector.load %arg6[%c0_77, %c1_78, %c0_79, %c0_80] : memref<1x6x8x128xf32, #tpu.memory_space<vmem>>, vector<1x1x2x128xf32>
    %269 = vector.shape_cast %268 : vector<1x1x2x128xf32> to vector<2x128xf32>
    %270 = arith.addf %269, %191 : vector<2x128xf32>
    %c0_81 = arith.constant 0 : index
    %c1_82 = arith.constant 1 : index
    %c0_83 = arith.constant 0 : index
    %c0_84 = arith.constant 0 : index
    %271 = vector.load %arg6[%c0_81, %c1_82, %c0_83, %c0_84] : memref<1x6x8x128xf32, #tpu.memory_space<vmem>>, vector<1x1x2x128xf32>
    %272 = vector.shape_cast %271 : vector<1x1x2x128xf32> to vector<2x128xf32>
    %273 = vector.shape_cast %270 : vector<2x128xf32> to vector<1x1x2x128xf32>
    tpu.vector_store %arg6[%c0_81, %c1_82, %c0_83, %c0_84], %273 {strides = array<i32>} : memref<1x6x8x128xf32, #tpu.memory_space<vmem>>, vector<1x1x2x128xf32>,
    %c0_85 = arith.constant 0 : index
    %c4_86 = arith.constant 4 : index
    %c0_87 = arith.constant 0 : index
    %c0_88 = arith.constant 0 : index
    %274 = vector.load %arg6[%c0_85, %c4_86, %c0_87, %c0_88] : memref<1x6x8x128xf32, #tpu.memory_space<vmem>>, vector<1x1x2x128xf32>
    %275 = vector.shape_cast %274 : vector<1x1x2x128xf32> to vector<2x128xf32>
    %276 = arith.addf %275, %194 : vector<2x128xf32>
    %c0_89 = arith.constant 0 : index
    %c4_90 = arith.constant 4 : index
    %c0_91 = arith.constant 0 : index
    %c0_92 = arith.constant 0 : index
    %277 = vector.load %arg6[%c0_89, %c4_90, %c0_91, %c0_92] : memref<1x6x8x128xf32, #tpu.memory_space<vmem>>, vector<1x1x2x128xf32>
    %278 = vector.shape_cast %277 : vector<1x1x2x128xf32> to vector<2x128xf32>
    %279 = vector.shape_cast %276 : vector<2x128xf32> to vector<1x1x2x128xf32>
    tpu.vector_store %arg6[%c0_89, %c4_90, %c0_91, %c0_92], %279 {strides = array<i32>} : memref<1x6x8x128xf32, #tpu.memory_space<vmem>>, vector<1x1x2x128xf32>,
    %c0_93 = arith.constant 0 : index
    %c2_94 = arith.constant 2 : index
    %c0_95 = arith.constant 0 : index
    %c0_96 = arith.constant 0 : index
    %280 = vector.load %arg6[%c0_93, %c2_94, %c0_95, %c0_96] : memref<1x6x8x128xf32, #tpu.memory_space<vmem>>, vector<1x1x2x128xf32>
    %281 = vector.shape_cast %280 : vector<1x1x2x128xf32> to vector<2x128xf32>
    %282 = arith.addf %281, %252 : vector<2x128xf32>
    %c0_97 = arith.constant 0 : index
    %c2_98 = arith.constant 2 : index
    %c0_99 = arith.constant 0 : index
    %c0_100 = arith.constant 0 : index
    %283 = vector.load %arg6[%c0_97, %c2_98, %c0_99, %c0_100] : memref<1x6x8x128xf32, #tpu.memory_space<vmem>>, vector<1x1x2x128xf32>
    %284 = vector.shape_cast %283 : vector<1x1x2x128xf32> to vector<2x128xf32>
    %285 = vector.shape_cast %282 : vector<2x128xf32> to vector<1x1x2x128xf32>
    tpu.vector_store %arg6[%c0_97, %c2_98, %c0_99, %c0_100], %285 {strides = array<i32>} : memref<1x6x8x128xf32, #tpu.memory_space<vmem>>, vector<1x1x2x128xf32>,
    %c0_101 = arith.constant 0 : index
    %c5_102 = arith.constant 5 : index
    %c0_103 = arith.constant 0 : index
    %c0_104 = arith.constant 0 : index
    %286 = vector.load %arg6[%c0_101, %c5_102, %c0_103, %c0_104] : memref<1x6x8x128xf32, #tpu.memory_space<vmem>>, vector<1x1x2x128xf32>
    %287 = vector.shape_cast %286 : vector<1x1x2x128xf32> to vector<2x128xf32>
    %288 = arith.addf %287, %255 : vector<2x128xf32>
    %c0_105 = arith.constant 0 : index
    %c5_106 = arith.constant 5 : index
    %c0_107 = arith.constant 0 : index
    %c0_108 = arith.constant 0 : index
    %289 = vector.load %arg6[%c0_105, %c5_106, %c0_107, %c0_108] : memref<1x6x8x128xf32, #tpu.memory_space<vmem>>, vector<1x1x2x128xf32>
    %290 = vector.shape_cast %289 : vector<1x1x2x128xf32> to vector<2x128xf32>
    %291 = vector.shape_cast %288 : vector<2x128xf32> to vector<1x1x2x128xf32>
    tpu.vector_store %arg6[%c0_105, %c5_106, %c0_107, %c0_108], %291 {strides = array<i32>} : memref<1x6x8x128xf32, #tpu.memory_space<vmem>>, vector<1x1x2x128xf32>,
    return
  }
  func.func @transform_0(%arg0: i32, %arg1: i32) -> i32 {
    %c0_i32 = arith.constant 0 : i32
    %c0_i32_0 = arith.constant 0 : i32
    return %c0_i32 : i32
  }
  func.func @transform_1(%arg0: i32, %arg1: i32) -> (i32, i32, i32, i32) {
    %c0_i32 = arith.constant 0 : i32
    %c0_i32_0 = arith.constant 0 : i32
    %c0_i32_1 = arith.constant 0 : i32
    return %arg0, %c0_i32, %arg1, %c0_i32_0 : i32, i32, i32, i32
  }
  func.func @transform_2(%arg0: i32, %arg1: i32) -> (i32, i32, i32, i32) {
    %c0_i32 = arith.constant 0 : i32
    %c0_i32_0 = arith.constant 0 : i32
    %c0_i32_1 = arith.constant 0 : i32
    return %arg0, %c0_i32, %arg1, %c0_i32_0 : i32, i32, i32, i32
  }
  func.func @transform_3(%arg0: i32, %arg1: i32) -> (i32, i32, i32, i32) {
    %c0_i32 = arith.constant 0 : i32
    %c0_i32_0 = arith.constant 0 : i32
    %c0_i32_1 = arith.constant 0 : i32
    return %arg0, %c0_i32, %arg1, %c0_i32_0 : i32, i32, i32, i32
  }
  func.func @transform_4(%arg0: i32, %arg1: i32) -> (i32, i32, i32, i32) {
    %c0_i32 = arith.constant 0 : i32
    %c0_i32_0 = arith.constant 0 : i32
    %c0_i32_1 = arith.constant 0 : i32
    %c0_i32_2 = arith.constant 0 : i32
    return %arg0, %c0_i32, %c0_i32_0, %c0_i32_1 : i32, i32, i32, i32
  }
}

</mosaic_0001>

<bundles_post_ra>
// kernel: _q_def_loss_impl.1
= control target key start
LH: loop header
LB: loop body
LE: loop exit
PB: predicated region body
PF: predicated region fallthrough
CT: control target
= control target key end

     0   :  { %9 = vsyncpa [#allocation3], 0  ;;  %s797_s15 = smov 0   ;;  %s799_s16 = smov 0   ;;  %s1047_s0 = inlined_call_operand.vmem [shape: f32[40], index: 0, kind: input, shape index: {}]   ;;  %s1048_s1 = inlined_call_operand.vmem [shape: f32[2,6,2,128], index: 1, kind: input, shape index: {}]   ;;  %s1049_s2 = inlined_call_operand.vmem [shape: f32[2,3,2,128], index: 2, kind: input, shape index: {}]   ;;  %s1050_s3 = inlined_call_operand.vmem [shape: f32[2,2,2,128], index: 3, kind: input, shape index: {}]   ;;  %s1051_s4 = inlined_call_operand.vmem [shape: f32[2,6,8,128], index: 4, kind: output, shape index: {}]  }
   0x1   :  { %s801_s17 = smov 0  }
   0x2 LB: > { %s640_s18 = sadd.s32 4294967295, %s768_s17   ;;  %s27_s19 = sadd.s32 1, %s764_s16  ;;  %s768_s17 = sphi %s801_s17, %s15_s17   ;;  %s764_s16 = sphi %s799_s16, %s1061_s16   ;;  %s760_s15 = sphi %s797_s15, %s1060_s15  }
   0x3   : > { %p29_p0 = scmp.ge.s32.totalorder %s27_s19, 2  ;;  %p642_p1 = scmp.ge.s32.totalorder %s768_s17, 1 }
   0x4   : > { %p163_p2 = scmp.lt.s32.totalorder %s768_s17, 3  ;;  %p822_p4 = scmp.eq.s32.totalorder %s640_s18, 0 }
   0x5   : > { %s1063_s19 = smov (%p29_p0, %s27_s19), 0  ;;  %s176_s24 = sshll.u32 %s1047_s0, 4  ;;  %s177_s24 = int_to_ptr.vmem [resolvable:$true] %s176_s24 }
   0x6   : > { %p818_p3 = pnand %p642_p1, %p163_p2  ;;  %s727_s25 = scalar_lea.vmem %s177_s24, 16 }
   0x7   : > { %p728_p7 = scmp.ne.s32.totalorder %s177_s24, %s727_s25  ;;  %p735_p11 = scmp.lt.s32.totalorder %s177_s24, %s177_s24 }
   0x8   : > { %p689_p5 = pneg %p818_p3  ;;  %p736_p12 = scmp.lt.s32.totalorder %s727_s25, %s727_s25 }
   0xa   : > { %p690_p6 = pnand %p822_p4, %p689_p5  ;;  %p737_p13 = por %p736_p12, %p735_p11 }
   0xc   : > { %p729_p8 = pneg %p690_p6 }
   0xe   : > { %p730_p9 = pnand %p729_p8, %p728_p7 }
  0x10   : > { %p731_p10 = pneg %p730_p9 }
  0x12   : > { %p738_p0 = pnand %p737_p13, %p731_p10 }
  0x14   : > { %741 = shalt.err (!%p738_p0)
}
  0x15   : > { %s770_s26 = smov [#allocation2]   ;;  %222 = sbr.rel (%p818_p3) target bundleno = 98 (0x62), region = 36 }
  0x16   : > { %692 = dma.vmem_to_smem (!%p690_p6), %s177_s24, 16, %s770_s26, [#allocation3]  }
  0x1a   : > { %755 = dma.done.wait (%p822_p4), [#allocation3], 16  }
  0x1b   : > { %757 = vsyncadd (%p822_p4), [#allocation3], 4294967280 }
  0x1c   : > { %228 = sfence }
  0x1d   : > { %p268_p1 = scmp.lt.s32.totalorder %s760_s15, 1  ;;  %v771_v0 = vmov 0.0   ;;  %s862_s6 = smul.u32 20, %s760_s15 }
  0x1f   : > { %s841_s27 = scalar_select %p268_p1, %s760_s15, 1 }
  0x20   : > { %s325_s8 = sadd.s32 9, %s862_s6  ;;  %s327_s9 = sadd.s32 10, %s862_s6 }
  0x21   : > { %s684_s28 = smul.u32 48, %s841_s27  ;;  %s872_s13 = sld [smem:[#allocation2 + %s325_s8]] }
  0x22   : > { %s682_s7 = smul.u32 12, %s841_s27  ;;  %s331_s14 = sadd.s32 12, %s862_s6 }
  0x23   : > { %s847_s5 = scalar_lea.vmem %s1051_s4, %s684_s28  ;;  %s875_s15 = sld [smem:[#allocation2 + %s327_s9]] }
  0x24   : > { %301 = vst [vmem:[%s847_s5] sm:$0xff] %v771_v0  ;;  %302 = vst [vmem:[%s847_s5 + $0x8] sm:$0xff] %v771_v0  ;;  %s870_s12 = scalar_lea.vmem %s1048_s1, %s682_s7  ;;  %s333_s18 = sadd.s32 13, %s862_s6 }
  0x25   : > { %303 = vst [vmem:[%s847_s5 + $0x10] sm:$0xff] %v771_v0  ;;  %304 = vst [vmem:[%s847_s5 + $0x18] sm:$0xff] %v771_v0  ;;  %s329_s20 = sadd.s32 11, %s862_s6  ;;  %s332_s21 = sld [smem:[#allocation2 + %s331_s14]]  ;;  %v354_v1 = vld [vmem:[%s870_s12] sm:$0x3] }
  0x26   : > { %305 = vst [vmem:[%s847_s5 + $0x20] sm:$0xff] %v771_v0  ;;  %306 = vst [vmem:[%s847_s5 + $0x28] sm:$0xff] %v771_v0  ;;  %s334_s22 = sld [smem:[#allocation2 + %s333_s18]]  ;;  %v654_v2 = vld [vmem:[%s870_s12 + $0x2] sm:$0x3]  ;;  %v653_v3 = vadd.f32 -0.5, %v354_v1 }
  0x27   : > { %s330_s23 = sld [smem:[#allocation2 + %s329_s20]]  ;;  %s323_s24 = sadd.s32 8, %s862_s6  ;;  %v655_v4 = vadd.f32 -0.5, %v654_v2  ;;  %v363_v6 = vstv %s872_s13  ;;  %v657_v10 = vld [vmem:[%s870_s12 + $0x4] sm:$0x3] }
  0x28   : > { %s335_s25 = sadd.s32 14, %s862_s6  ;;  %s683_s26 = smul.u32 6, %s841_s27  ;;  %v659_v12 = vld [vmem:[%s870_s12 + $0x6] sm:$0x3]  ;;  %v658_v15 = vadd.f32 -0.5, %v657_v10 }
  0x29   : > { %s337_s28 = sadd.s32 15, %s862_s6  ;;  %s886_s29 = sld [smem:[#allocation2 + %s323_s24]]  ;;  %v365_v9 = vstv %s875_s15  ;;  %v663_v16 = vld [vmem:[%s870_s12 + $0x8] sm:$0x3]  ;;  %v660_v18 = vadd.f32 -0.5, %v659_v12 }
  0x2a   : > { %s339_s30 = sadd.s32 16, %s862_s6  ;;  %s336_s7 = sld [smem:[#allocation2 + %s335_s25]]  ;;  %v665_v20 = vld [vmem:[%s870_s12 + $0xa] sm:$0x3]  ;;  %v664_v24 = vadd.f32 -0.5, %v663_v16 }
  0x2b   : > { %v356_v5 = vstv %s332_s21  ;;  %s341_s8 = sadd.s32 17, %s862_s6  ;;  %s338_s9 = sld [smem:[#allocation2 + %s337_s28]]  ;;  %v666_v30 = vadd.f32 -0.5, %v665_v20 }
  0x2c   : > { %v889_v7 = vmul.f32 %v653_v3, %v356_v5  ;;  %v361_v8 = vstv %s334_s22  ;;  %s900_s10 = sld [smem:[#allocation2 + %s339_s30]]  ;;  %s905_s15 = scalar_lea.vmem %s1049_s2, %s683_s26  ;;  %v669_v35 = vld [vmem:[%s847_s5 + $0x18] sm:$0x3] }
  0x2d   : > { %v894_v11 = vmul.f32 %v655_v4, %v361_v8  ;;  %s908_s18 = sld [smem:[#allocation2 + %s341_s8]]  ;;  %v911_v17 = vstv %s330_s23  ;;  %s309_s20 = sadd.s32 1, %s862_s6  ;;  %v386_v21 = vld [vmem:[%s905_s15] sm:$0x3]  ;;  %v661_v42 = vld [vmem:[%s905_s15 + $0x2] sm:$0x3] }
  0x2e   : > { %v364_v13 = vmul.f32 %v363_v6, %v889_v7  ;;  %s311_s21 = sadd.s32 2, %s862_s6  ;;  %s315_s22 = sadd.s32 4, %s862_s6  ;;  %vm387_vm0 = vcmp.ne.f32.partialorder %v386_v21, 0.0  ;;  %vm435_vm3 = vcmp.ne.f32.partialorder %v661_v42, 0.0  ;;  %v673_v50 = vld [vmem:[%s847_s5 + $0x20] sm:$0x3] }
  0x2f   : > { %v366_v14 = vmul.f32 %v365_v9, %v894_v11  ;;  %v416_v23 = vstv %s886_s29  ;;  %s922_s23 = sld [smem:[#allocation2 + %s309_s20]]  ;;  %s317_s24 = sadd.s32 5, %s862_s6  ;;  %v667_v51 = vld [vmem:[%s905_s15 + $0x4] sm:$0x3]  ;;  %v677_v2 = vld [vmem:[%s847_s5 + $0x28] sm:$0x3] }
  0x30   : > { %v409_v22 = vstv %s336_s7  ;;  %s928_s12 = sld [smem:[#allocation2 + %s311_s21]]  ;;  %s319_s28 = sadd.s32 6, %s862_s6  ;;  %vm480_vm6 = vcmp.ne.f32.partialorder %v667_v51, 0.0 }
  0x31   : > { %v367_v19 = vadd.f32 %v366_v14, %v364_v13  ;;  %v920_v26 = vmul.f32 %v658_v15, %v409_v22  ;;  %v414_v27 = vstv %s338_s9  ;;  %s931_s25 = sld [smem:[#allocation2 + %s315_s22]]  ;;  %s321_s29 = sadd.s32 7, %s862_s6 }
  0x32   : > { %v925_v28 = vmul.f32 %v660_v18, %v414_v27  ;;  %v457_v29 = vstv %s900_s10  ;;  %s936_s26 = sld [smem:[#allocation2 + %s317_s24]]  ;;  %s313_s7 = sadd.s32 3, %s862_s6 }
  0x33   : > { %v369_v25 = vadd.f32 %v911_v17, %v367_v19  ;;  %v417_v32 = vmul.f32 %v416_v23, %v920_v26  ;;  %v934_v34 = vmul.f32 %v664_v24, %v457_v29  ;;  %v462_v36 = vstv %s908_s18  ;;  %s955_s30 = sld [smem:[#allocation2 + %s319_s28]]  ;;  %s343_s9 = sadd.s32 18, %s862_s6 }
  0x34   : > { %v418_v33 = vmul.f32 %v925_v28, %v365_v9  ;;  %v946_v39 = vmul.f32 %v666_v30, %v462_v36  ;;  %s959_s8 = sld [smem:[#allocation2 + %s321_s29]]  ;;  %s345_s11 = sadd.s32 19, %s862_s6 }
  0x35   : > { %v384_v31 = vand.u32 2147483647, %v369_v25  ;;  %v464_v43 = vmul.f32 %v934_v34, %v416_v23  ;;  %s967_s10 = sld [smem:[#allocation2 + %s862_s6]]  ;;  %v370_v49 = vstv %s922_s23  ;;  %s681_s13 = sshll.u32 %s841_s27, 2 }
  0x36   : > { %v419_v38 = vadd.f32 %v418_v33, %v417_v32  ;;  %v465_v46 = vmul.f32 %v946_v39, %v363_v6  ;;  %s970_s14 = sld [smem:[#allocation2 + %s313_s7]]  ;;  %v372_v52 = vstv %s928_s12  ;;  %v371_v61 = vmul.f32 %v370_v49, %v889_v7  ;;  %s291_s20 = scalar_lea.vmem %s1050_s3, %s681_s13 }
  0x37   : > { %vm385_vm1 = vcmp.gt.f32.partialorder %v384_v31, 0.0001  ;;  %s975_s18 = sld [smem:[#allocation2 + %s343_s9]]  ;;  %v377_v53 = vstv %s931_s25  ;;  %v373_v62 = vmul.f32 %v372_v52, %v894_v11  ;;  %v652_v18 = vld [vmem:[%s291_s20 + $0x2] sm:$0x3]  ;;  %v469_v33 = vmul.f32 %v946_v39, %v370_v49 }
  0x38   : > { %vm942_vm2 = vmand %vm385_vm1, %vm387_vm0  ;;  %v420_v45 = vadd.f32 %v419_v38, %v911_v17  ;;  %v466_v48 = vadd.f32 %v465_v46, %v464_v43  ;;  %v379_v54 = vstv %s936_s26  ;;  %s985_s6 = sld [smem:[#allocation2 + %s345_s11]]  ;;  %v378_v63 = vmul.f32 %v377_v53, %v889_v7 }
  0x39   : > { %v389_v40 = vsel %vm942_vm2, %v369_v25, 1.0  ;;  %v656_v41 = vsel %vm942_vm2, 1.0, %v771_v0  ;;  %v380_v1 = vmul.f32 %v379_v54, %v894_v11  ;;  %v374_v8 = vadd.f32 %v373_v62, %v371_v61 }
  0x3a   : > { %721 = vrcp.f32 %v389_v40  ;;  %v504_v44 = vadd.f32 %v669_v35, %v656_v41  ;;  %v431_v47 = vand.u32 2147483647, %v420_v45  ;;  %v467_v56 = vadd.f32 %v466_v48, %v911_v17  ;;  %v347_v17 = vld [vmem:[%s291_s20] sm:$0x3] }
  0x3b   : > { %v421_v4 = vstv %s967_s10  ;;  %v381_v9 = vadd.f32 %v380_v1, %v378_v63  ;;  %v375_v12 = vstv %s955_s30  ;;  %v382_v13 = vstv %s959_s8 }
  0x3c   : > { %670 = vst [vmem:[%s847_s5 + $0x18] sm:$0x3] %v504_v44  ;;  %vm432_vm4 = vcmp.gt.f32.partialorder %v431_v47, 0.0001  ;;  %v476_v60 = vand.u32 2147483647, %v467_v56  ;;  %v426_v5 = vstv %s970_s14  ;;  %v422_v19 = vmul.f32 %v421_v4, %v920_v26 }
  0x3d   : > { %vm980_vm5 = vmand %vm432_vm4, %vm435_vm3  ;;  %v348_v14 = vstv %s975_s18  ;;  %v427_v20 = vmul.f32 %v426_v5, %v920_v26  ;;  %v428_v21 = vmul.f32 %v925_v28, %v379_v54  ;;  %v376_v22 = vadd.f32 %v375_v12, %v374_v8  ;;  %v499_v54 = vld [vmem:[%s847_s5] sm:$0x3] }
  0x3e   : > { %v437_v57 = vsel %vm980_vm5, %v420_v45, 1.0  ;;  %v662_v58 = vsel %vm980_vm5, 1.0, %v771_v0  ;;  %vm477_vm7 = vcmp.gt.f32.partialorder %v476_v60, 0.0001  ;;  %v352_v15 = vstv %s985_s6 }
  0x3f   : > { %723 = vrcp.f32 %v437_v57  ;;  %v512_v59 = vadd.f32 %v673_v50, %v662_v58  ;;  %vm999_vm8 = vmand %vm477_vm7, %vm480_vm6  ;;  %v383_v23 = vadd.f32 %v382_v13, %v381_v9  ;;  %v349_v25 = vmul.f32 %v348_v14, %v347_v17  ;;  %v675_v14 = vld [vmem:[%s847_s5 + $0x10] sm:$0x3] }
  0x40   : > { %v482_v6 = vsel %vm999_vm8, %v467_v56, 1.0  ;;  %v668_v7 = vsel %vm999_vm8, 1.0, %v771_v0  ;;  %v423_v0 = vmul.f32 %v925_v28, %v372_v52  ;;  %v353_v27 = vmul.f32 %v652_v18, %v352_v15 }
  0x41   : > { %674 = vst [vmem:[%s847_s5 + $0x20] sm:$0x3] %v512_v59  ;;  %725 = vrcp.f32 %v482_v6  ;;  %v520_v10 = vadd.f32 %v677_v2, %v668_v7  ;;  %v429_v31 = vadd.f32 %v428_v21, %v427_v20  ;;  %v468_v32 = vmul.f32 %v934_v34, %v421_v4  ;;  %v671_v7 = vld [vmem:[%s847_s5 + $0x8] sm:$0x3] }
  0x42   : > { %v424_v30 = vadd.f32 %v423_v0, %v422_v19  ;;  %v472_v26 = vmul.f32 %v934_v34, %v426_v5  ;;  %v473_v28 = vmul.f32 %v946_v39, %v377_v53 }
  0x43   : > { %678 = vst [vmem:[%s847_s5 + $0x28] sm:$0x3] %v520_v10  ;;  %v430_v44 = vadd.f32 %v429_v31, %v382_v13  ;;  %v470_v48 = vadd.f32 %v469_v33, %v468_v32 }
  0x44   : > { %v425_v43 = vadd.f32 %v424_v30, %v375_v12  ;;  %v474_v50 = vadd.f32 %v473_v28, %v472_v26 }
  0x45   : > { %v471_v53 = vadd.f32 %v470_v48, %v375_v12 }
  0x47   : > { %v722_v11 = vpop.eup %721 }
  0x48   : > { %v391_v16 = vmul.f32 %v722_v11, %v389_v40 }
  0x4a   : > { %v392_v24 = vsub.f32 2.0, %v391_v16 }
  0x4c   : > { %v393_v29 = vmul.f32 %v722_v11, %v392_v24  ;;  %v724_v35 = vpop.eup %723 }
  0x4d   : > { %v439_v40 = vmul.f32 %v724_v35, %v437_v57  ;;  %v475_v57 = vadd.f32 %v474_v50, %v382_v13 }
  0x4e   : > { %v394_v36 = vmul.f32 %v393_v29, %v376_v22  ;;  %v397_v38 = vmul.f32 %v393_v29, %v383_v23  ;;  %v726_v49 = vpop.eup %725 }
  0x4f   : > { %v440_v45 = vsub.f32 2.0, %v439_v40  ;;  %v484_v56 = vmul.f32 %v726_v49, %v482_v6 }
  0x50   : > { %v395_v41 = vsub.f32 %v394_v36, %v349_v25  ;;  %v398_v42 = vsub.f32 %v397_v38, %v353_v27 }
  0x51   : > { %v441_v51 = vmul.f32 %v724_v35, %v440_v45  ;;  %v485_v59 = vsub.f32 2.0, %v484_v56 }
  0x52   : > { %v396_v46 = vand.u32 2147483647, %v395_v41  ;;  %v399_v47 = vand.u32 2147483647, %v398_v42 }
  0x53   : > { %v442_v58 = vmul.f32 %v441_v51, %v425_v43  ;;  %v445_v34 = vmul.f32 %v441_v51, %v430_v44  ;;  %v486_v63 = vmul.f32 %v726_v49, %v485_v59 }
  0x54   : > { %v400_v52 = vadd.f32 %v399_v47, %v396_v46 }
  0x55   : > { %v443_v61 = vsub.f32 %v442_v58, %v349_v25  ;;  %v446_v62 = vsub.f32 %v445_v34, %v353_v27  ;;  %v487_v4 = vmul.f32 %v486_v63, %v471_v53  ;;  %v490_v5 = vmul.f32 %v486_v63, %v475_v57 }
  0x56   : > { %v401_v39 = vsel %vm942_vm2, %v400_v52, 0.0 }
  0x57   : > { %v500_v60 = vadd.f32 %v499_v54, %v401_v39  ;;  %v444_v1 = vand.u32 2147483647, %v443_v61  ;;  %v447_v2 = vand.u32 2147483647, %v446_v62  ;;  %v488_v8 = vsub.f32 %v487_v4, %v349_v25 }
  0x58   : > { %v491_v37 = vsub.f32 %v490_v5, %v353_v27 }
  0x59   : > { %501 = vst [vmem:[%s847_s5] sm:$0x3] %v500_v60  ;;  %v448_v6 = vadd.f32 %v447_v2, %v444_v1  ;;  %v489_v11 = vand.u32 2147483647, %v488_v8 }
  0x5a   : > { %v492_v12 = vand.u32 2147483647, %v491_v37 }
  0x5b   : > { %v449_v9 = vsel %vm980_vm5, %v448_v6, 0.0 }
  0x5c   : > { %v508_v10 = vadd.f32 %v671_v7, %v449_v9  ;;  %v493_v13 = vadd.f32 %v492_v12, %v489_v11 }
  0x5e   : > { %672 = vst [vmem:[%s847_s5 + $0x8] sm:$0x3] %v508_v10  ;;  %v494_v15 = vsel %vm999_vm8, %v493_v13, 0.0 }
  0x5f   : > { %v516_v16 = vadd.f32 %v675_v14, %v494_v15 }
  0x61   : > { %676 = vst [vmem:[%s847_s5 + $0x10] sm:$0x3] %v516_v16 }
  0x62 PF: > { %s15_s17 = sadd.s32 1, %s768_s17   ;;  %s1060_s15 = smov %s764_s16 }
  0x63   : > { %p12_p2 = scmp.ge.s32.totalorder %s15_s17, 4   ;;  %s1061_s16 = smov %s1063_s19 }
  0x65   :  { %14 = sbr.rel (!%p12_p2) target bundleno = 2 (0x2), region = 94 }
  0x6a   :  { %543 = vsyncpa [#allocation3], 1 }
  0x6b   :  { %545 = vsyncpa [#allocation3 + $0x1], 1 }

</bundles_post_ra>
